<compile_context>
chip_gen: v7x
topology: tpu7x:2x2x1
jax: 0.10.0
libtpu: 0.0.40
codegen_flags: <defaults>
</compile_context>

<pallas_src>
import jax
import jax.numpy as jnp
from jax.experimental import pallas as pl
from jax.experimental.pallas import tpu as pltpu


def _pa_kernel(x_ref, w1_ref, b1_ref, w2_ref, b2_ref, o_ref):
    # x_ref : (1, C, T)   channels on sublanes, spatial tile on lanes
    # w1_ref: (C//2, C)   conv1 weight (out, in), same dtype as x
    # b1_ref: (C//2, 1)   f32
    # w2_ref: (C//2, 1)   f32 (conv2 weight laid out as a column)
    # b2_ref: (1,)        f32 scalar, SMEM
    # o_ref : (1, C, T)
    x = x_ref[0]                                              # (C, T)

    # 1x1 conv #1 + bias + ReLU  (MXU, f32 accumulation).
    h = jnp.dot(w1_ref[...], x,
                preferred_element_type=jnp.float32,
                precision=jax.lax.Precision.HIGHEST)          # (C//2, T)
    h = jnp.maximum(h + b1_ref[...], 0.0)

    # 1x1 conv #2 (single output channel) + bias + sigmoid.
    # VPU multiply + sublane reduction; avoids the degenerate N=1 MXU matmul
    # and keeps y lane-dense as (1, T).
    y = jnp.sum(h * w2_ref[...], axis=0, keepdims=True) + b2_ref[0]
    y = jax.nn.sigmoid(y)                                     # (1, T)

    # Scale: (1, T) broadcasts over channels on the sublane axis; store is
    # lane-dense (T is a multiple of 128 or the full spatial extent).
    o_ref[0] = (x.astype(jnp.float32) * y).astype(o_ref.dtype)


def _pick_spatial_tile(hw, target):
    """Largest lane-friendly spatial tile that divides hw (no padding copies)."""
    if hw <= target:
        return hw
    t = (target // 128) * 128
    while t >= 128:
        if hw % t == 0:
            return t
        t -= 128
    # TODO(synk): ragged H*W with no multiple-of-128 divisor falls back to a
    # whole image per grid step; a masked/padded tail block would be the
    # alternative for very large ragged images.
    return hw


def pa_layer(x_nchw, w1, b1, w2, b2, *, tile_hw=2048):
    """Pixel attention (PALayer).

    x_nchw: (N, C, H, W)
    w1: (C//2, C)  conv1 1x1 weight (out, in),  b1: (C//2,)
    w2: (1, C//2)  conv2 1x1 weight,            b2: (1,)
    """
    n, c, h, w = x_nchw.shape
    c_half = c // 2
    hw = h * w

    # NCHW kept as-is; only a free reshape that merges the trailing spatial dims.
    x_flat = x_nchw.reshape(n, c, hw)

    # Pre-cast / reshape params once in the wrapper (no per-step casts in-kernel).
    w1_m = w1.reshape(c_half, c).astype(x_nchw.dtype)
    b1_m = b1.reshape(c_half, 1).astype(jnp.float32)
    w2_m = w2.reshape(c_half, 1).astype(jnp.float32)   # column for sublane reduce
    b2_m = b2.reshape(1).astype(jnp.float32)            # scalar -> SMEM

    t = _pick_spatial_tile(hw, tile_hw)
    grid = (n, hw // t)   # fully parallel; >=2 steps keeps both v7x cores busy

    # VMEM budget: double-buffered input + output tiles (+ tiny weights) with
    # headroom, capped so the scoped limit also fits v7x's 64 MiB physical VMEM.
    tile_bytes = c * t * x_nchw.dtype.itemsize
    vmem_need = 4 * tile_bytes + (c_half * c + 2 * c_half) * 4
    vmem_limit = int(min(48 * 2**20, max(2 * vmem_need, 16 * 2**20)))

    out_flat = pl.pallas_call(
        _pa_kernel,
        out_shape=jax.ShapeDtypeStruct((n, c, hw), x_nchw.dtype),
        grid_spec=pltpu.PrefetchScalarGridSpec(
            num_scalar_prefetch=0,
            grid=grid,
            in_specs=[
                pl.BlockSpec((1, c, t), lambda i, s: (i, 0, s)),      # x tile
                pl.BlockSpec((c_half, c), lambda i, s: (0, 0)),       # w1 (resident)
                pl.BlockSpec((c_half, 1), lambda i, s: (0, 0)),       # b1
                pl.BlockSpec((c_half, 1), lambda i, s: (0, 0)),       # w2 column
                pl.BlockSpec(memory_space=pltpu.MemorySpace.SMEM),    # b2 scalar
            ],
            out_specs=pl.BlockSpec((1, c, t), lambda i, s: (i, 0, s)),
        ),
        compiler_params=pltpu.CompilerParams(
            dimension_semantics=("parallel", "parallel"),
            vmem_limit_bytes=vmem_limit),
    )(x_flat, w1_m, b1_m, w2_m, b2_m)

    return out_flat.reshape(n, c, h, w)


def pa_layer_ref(x, w1, b1, w2, b2):
    """Pure-JAX reference (mirrors the PyTorch PALayer)."""
    xf = x.astype(jnp.float32)
    hp = jnp.einsum("nchw,oc->nohw", xf, w1.astype(jnp.float32),
                    precision=jax.lax.Precision.HIGHEST) + b1[None, :, None, None]
    hp = jnp.maximum(hp, 0.0)
    y = jnp.einsum("nchw,oc->nohw", hp, w2.astype(jnp.float32),
                   precision=jax.lax.Precision.HIGHEST) + b2[None, :, None, None]
    y = jax.nn.sigmoid(y)  # (N, 1, H, W)
    return (xf * y).astype(x.dtype)


if __name__ == "__main__":
    key = jax.random.PRNGKey(0)
    k_x, k_w1, k_b1, k_w2, k_b2 = jax.random.split(key, 5)

    N, C, H, W = 2, 4, 16, 16
    C2 = C // 2

    x = jax.random.normal(k_x, (N, C, H, W), dtype=jnp.float32)
    # Deterministic synthetic params (shapes match nn.Conv2d with 1x1 kernels).
    w1 = jax.random.normal(k_w1, (C2, C), dtype=jnp.float32) * 0.5   # conv1 weight
    b1 = jax.random.normal(k_b1, (C2,), dtype=jnp.float32) * 0.1     # conv1 bias
    w2 = jax.random.normal(k_w2, (1, C2), dtype=jnp.float32) * 0.5   # conv2 weight
    b2 = jax.random.normal(k_b2, (1,), dtype=jnp.float32) * 0.1      # conv2 bias

    out = jax.block_until_ready(pa_layer(x, w1, b1, w2, b2))
    ref = pa_layer_ref(x, w1, b1, w2, b2)

    assert out.shape == (N, C, H, W)
    assert jnp.allclose(out, ref, atol=1e-5, rtol=1e-5), "mismatch vs reference"

    print("KERNEL_OK")
</pallas_src>

<mosaic_0001>
module attributes {stable_mosaic.version = 11 : i64} {
  func.func @_pa_kernel(%arg0: i32, %arg1: i32, %arg2: memref<1x4x256xf32, #tpu.memory_space<vmem>>, %arg3: memref<2x4xf32, #tpu.memory_space<vmem>>, %arg4: memref<2x1xf32, #tpu.memory_space<vmem>>, %arg5: memref<2x1xf32, #tpu.memory_space<vmem>>, %arg6: memref<1xf32, #tpu.memory_space<smem>>, %arg7: memref<1x4x256xf32, #tpu.memory_space<vmem>>) attributes {dimension_semantics = [#tpu.dimension_semantics<parallel>, #tpu.dimension_semantics<parallel>], iteration_bounds = array<i64: 2, 1>, scalar_prefetch = 0 : i64, scratch_operands = 0 : i64, tpu.core_type = #tpu.core_type<tc>, window_params = [{transform_indices = @transform_0, window_bounds = array<i64: 1, 4, 256>}, {pipeline_mode = #tpu.pipeline_mode<synchronous>, transform_indices = @transform_1, window_bounds = array<i64: 2, 4>}, {pipeline_mode = #tpu.pipeline_mode<synchronous>, transform_indices = @transform_2, window_bounds = array<i64: 2, 1>}, {pipeline_mode = #tpu.pipeline_mode<synchronous>, transform_indices = @transform_3, window_bounds = array<i64: 2, 1>}, {transform_indices = @transform_4, window_bounds = array<i64: 1>}, {transform_indices = @transform_5, window_bounds = array<i64: 1, 4, 256>}]} {
    %c0 = arith.constant 0 : index
    %c0_0 = arith.constant 0 : index
    %c0_1 = arith.constant 0 : index
    %0 = vector.load %arg2[%c0, %c0_0, %c0_1] : memref<1x4x256xf32, #tpu.memory_space<vmem>>, vector<1x4x256xf32>
    %1 = vector.shape_cast %0 : vector<1x4x256xf32> to vector<4x256xf32>
    %c0_2 = arith.constant 0 : index
    %c0_3 = arith.constant 0 : index
    %2 = vector.load %arg3[%c0_2, %c0_3] : memref<2x4xf32, #tpu.memory_space<vmem>>, vector<2x4xf32>
    %cst = arith.constant dense<0.000000e+00> : vector<2x256xf32>
    %3 = tpu.matmul %2, %1, %cst {dimension_numbers = #tpu.dot_dimension_numbers<[1], [0], [0], [1], [0, 0, 1, 1], [], []>, precision = #tpu.contract_precision<fp32>} : vector<2x4xf32>, vector<4x256xf32>, vector<2x256xf32> -> vector<2x256xf32>
    %c0_4 = arith.constant 0 : index
    %c0_5 = arith.constant 0 : index
    %4 = vector.load %arg4[%c0_4, %c0_5] : memref<2x1xf32, #tpu.memory_space<vmem>>, vector<2x1xf32>
    %5 = vector.broadcast %4 : vector<2x1xf32> to vector<2x256xf32>
    %6 = arith.addf %3, %5 : vector<2x256xf32>
    %cst_6 = arith.constant 0.000000e+00 : f32
    %7 = vector.broadcast %cst_6 : f32 to vector<2x256xf32>
    %8 = arith.maximumf %6, %7 : vector<2x256xf32>
    %c0_7 = arith.constant 0 : index
    %c0_8 = arith.constant 0 : index
    %9 = vector.load %arg5[%c0_7, %c0_8] : memref<2x1xf32, #tpu.memory_space<vmem>>, vector<2x1xf32>
    %10 = vector.broadcast %9 : vector<2x1xf32> to vector<2x256xf32>
    %11 = arith.mulf %8, %10 : vector<2x256xf32>
    %cst_9 = arith.constant dense<0.000000e+00> : vector<256xf32>
    %12 = vector.multi_reduction <add>, %11, %cst_9 [0] : vector<2x256xf32> to vector<256xf32>
    %13 = vector.shape_cast %12 : vector<256xf32> to vector<1x256xf32>
    %c0_10 = arith.constant 0 : index
    %14 = memref.load %arg6[%c0_10] : memref<1xf32, #tpu.memory_space<smem>>
    %15 = vector.broadcast %14 : f32 to vector<1x256xf32>
    %16 = arith.addf %13, %15 : vector<1x256xf32>
    %17 = arith.negf %16 : vector<1x256xf32>
    %18 = math.exp %17 : vector<1x256xf32>
    %cst_11 = arith.constant 1.000000e+00 : f32
    %19 = vector.broadcast %cst_11 : f32 to vector<1x256xf32>
    %20 = arith.addf %19, %18 : vector<1x256xf32>
    %21 = arith.divf %19, %20 : vector<1x256xf32>
    %22 = vector.broadcast %21 : vector<1x256xf32> to vector<4x256xf32>
    %23 = arith.mulf %1, %22 : vector<4x256xf32>
    %c0_12 = arith.constant 0 : index
    %c0_13 = arith.constant 0 : index
    %c0_14 = arith.constant 0 : index
    %24 = vector.load %arg7[%c0_12, %c0_13, %c0_14] : memref<1x4x256xf32, #tpu.memory_space<vmem>>, vector<1x4x256xf32>
    %25 = vector.shape_cast %24 : vector<1x4x256xf32> to vector<4x256xf32>
    %26 = vector.shape_cast %23 : vector<4x256xf32> to vector<1x4x256xf32>
    tpu.vector_store %arg7[%c0_12, %c0_13, %c0_14], %26 {strides = array<i32>} : memref<1x4x256xf32, #tpu.memory_space<vmem>>, vector<1x4x256xf32>,
    return
  }
  func.func @transform_0(%arg0: i32, %arg1: i32) -> (i32, i32, i32) {
    %c0_i32 = arith.constant 0 : i32
    %c0_i32_0 = arith.constant 0 : i32
    return %arg0, %c0_i32, %arg1 : i32, i32, i32
  }
  func.func @transform_1(%arg0: i32, %arg1: i32) -> (i32, i32) {
    %c0_i32 = arith.constant 0 : i32
    %c0_i32_0 = arith.constant 0 : i32
    %c0_i32_1 = arith.constant 0 : i32
    return %c0_i32, %c0_i32_0 : i32, i32
  }
  func.func @transform_2(%arg0: i32, %arg1: i32) -> (i32, i32) {
    %c0_i32 = arith.constant 0 : i32
    %c0_i32_0 = arith.constant 0 : i32
    %c0_i32_1 = arith.constant 0 : i32
    return %c0_i32, %c0_i32_0 : i32, i32
  }
  func.func @transform_3(%arg0: i32, %arg1: i32) -> (i32, i32) {
    %c0_i32 = arith.constant 0 : i32
    %c0_i32_0 = arith.constant 0 : i32
    %c0_i32_1 = arith.constant 0 : i32
    return %c0_i32, %c0_i32_0 : i32, i32
  }
  func.func @transform_4(%arg0: i32, %arg1: i32) -> i32 {
    %c0_i32 = arith.constant 0 : i32
    %c0_i32_0 = arith.constant 0 : i32
    return %c0_i32 : i32
  }
  func.func @transform_5(%arg0: i32, %arg1: i32) -> (i32, i32, i32) {
    %c0_i32 = arith.constant 0 : i32
    %c0_i32_0 = arith.constant 0 : i32
    return %arg0, %c0_i32, %arg1 : i32, i32, i32
  }
}

</mosaic_0001>

<bundles_post_ra>
// kernel: tpu_custom_call.1
= control target key start
LH: loop header
LB: loop body
LE: loop exit
PB: predicated region body
PF: predicated region fallthrough
CT: control target
= control target key end

     0   :  { %s1341_s0 = inlined_call_operand.hbm [shape: f32[2,4,256], index: 0, kind: input, shape index: {}]   ;;  %s1342_s1 = inlined_call_operand.vmem [shape: f32[2,4], index: 1, kind: input, shape index: {}]   ;;  %s1343_s2 = inlined_call_operand.vmem [shape: f32[2,1], index: 2, kind: input, shape index: {}]   ;;  %s1344_s3 = inlined_call_operand.vmem [shape: f32[2,1], index: 3, kind: input, shape index: {}]   ;;  %s1345_s4 = inlined_call_operand.<no memory space> [shape: f32[1], index: 4, kind: input, shape index: {}]   ;;  %s1346_s5 = inlined_call_operand.hbm [shape: f32[2,4,256], index: 5, kind: output, shape index: {}]  }
   0x1   :  { %10 = sst [smem:[#allocation2]] %s1345_s4 }
   0x2   :  { %11 = vsyncpa [#allocation4], 0 }
   0x3   :  { %13 = vsyncpa [#allocation4 + $0x1], 0 }
   0x4   :  { %14 = vsyncpa [#allocation5], 0 }
   0x5   :  { %16 = vsyncpa [#allocation5 + $0x1], 0  ;;  %s1150_s20 = smov 0   ;;  %s1152_s21 = smov 0  }
   0x6   :  { %s1154_s22 = smov 0   ;;  %s1156_s23 = smov 0  }
   0x7   :  { %s1158_s24 = smov 0   ;;  %s1160_s25 = smov 0  }
   0x8 LB: > { %s894_s4 = sadd.s32 4294967295, %s1111_s25   ;;  %s895_s26 = sadd.s32 4294967294, %s1111_s25   ;;  %s1111_s25 = sphi %s1160_s25, %s22_s25   ;;  %s1107_s24 = sphi %s1158_s24, %s1362_s24   ;;  %s1103_s23 = sphi %s1156_s23, %s1361_s23   ;;  %s1099_s22 = sphi %s1154_s22, %s1360_s22   ;;  %s1095_s21 = sphi %s1152_s21, %s1359_s21   ;;  %s1091_s20 = sphi %s1150_s20, %s1358_s20  }
   0x9   : > { %s34_s27 = sadd.s32 1, %s1107_s24  ;;  %s43_s28 = sadd.s32 1, %s1099_s22 }
   0xa   : > { %p36_p0 = scmp.ge.s32.totalorder %s34_s27, 2  ;;  %p50_p1 = scmp.ne.s32.totalorder %s1099_s22, %s1095_s21 }
   0xb   : > { %p51_p2 = scmp.eq.s32.totalorder %s1111_s25, 0  ;;  %p56_p3 = scmp.ne.s32.totalorder %s1095_s21, %s1091_s20 }
   0xc   : > { %s1364_s27 = smov (%p36_p0, %s34_s27), 0  ;;  %p57_p5 = scmp.eq.s32.totalorder %s894_s4, 0 }
   0xd   : > { %p1191_p4 = por %p51_p2, %p50_p1  ;;  %s38_s30 = ssub.s32 %s1107_s24, %s1364_s27 }
   0xe   : > { %p166_p6 = scmp.eq.s32.totalorder %s894_s4, 1  ;;  %p41_p7 = scmp.eq.s32.totalorder %s38_s30, 0 }
   0xf   : > { %p1197_p8 = por %p57_p5, %p56_p3  ;;  %p172_p10 = scmp.eq.s32.totalorder %s895_s26, 1 }
  0x10   : > { %p1201_p9 = por %p166_p6, %p50_p1  ;;  %p937_p13 = scmp.lt.s32.totalorder %s1111_s25, 2 }
  0x11   : > { %s1206_s8 = scalar_select %p41_p7, %s1099_s22, %s43_s28  }
  0x12   : > { %s1350_s7 = scalar_select %p1201_p9, 1, 0 }
  0x13   : > { %p1208_p11 = por %p172_p10, %p56_p3  ;;  %s204_s10 = sand.u32 1, %s1099_s22  }
  0x14   : > { %s898_s11 = sshll.u32 %s204_s10, 3  ;;  %s911_s12 = sshll.u32 %s1107_s24, 7 }
  0x15   : > { %s1351_s9 = scalar_select %p1208_p11, 1, 0 }
  0x16   : > { %s1219_s15 = scalar_lea.hbm %s1341_s0, %s911_s12  ;;  %s208_s16 = scalar_lea.vmem [#allocation3], %s898_s11 }
  0x17   : > { %s218_s17 = sshll.u32 %s208_s16, 4  ;;  %p1225_p0 = pnand %p937_p13, %p1191_p4  ;;  %s1221_s17 = int_to_ptr.vmem [resolvable:$true] %s218_s17 }
  0x18   : > { %s205_s19 = scalar_lea.sflag [#allocation4], %s204_s10  ;;  %s999_s4 = scalar_lea.hbm %s1219_s15, 128 }
  0x19   : > { %p1000_p3 = scmp.ne.s32.totalorder %s1219_s15, %s999_s4  ;;  %p1001_p5 = pneg %p1225_p0 }
  0x1a   : > { %s1004_s29 = scalar_lea.hbm %s1341_s0, 256  ;;  %p1005_p4 = scmp.lt.u32.totalorder %s1219_s15, %s1341_s0 }
  0x1b   : > { %p1002_p6 = pnand %p1001_p5, %p1000_p3  ;;  %p1006_p10 = scmp.lt.u32.totalorder %s1004_s29, %s999_s4 }
  0x1c   : > { %p1008_p12 = scmp.lt.u32.totalorder %s999_s4, %s1219_s15 }
  0x1d   : > { %p1003_p7 = pneg %p1002_p6  ;;  %p1007_p13 = por %p1006_p10, %p1005_p4 }
  0x1f   : > { %p1009_p1 = por %p1008_p12, %p1007_p13 }
  0x21   : > { %p1010_p2 = pnand %p1009_p1, %p1003_p7 }
  0x23   : > { %1013 = shalt.err (!%p1010_p2)
}
  0x24   : > { %s1014_s10 = scalar_lea.vmem %s1221_s17, 128  ;;  %s1113_s12 = smov [#allocation3]  }
  0x25   : > { %p1015_p3 = scmp.ne.s32.totalorder %s1221_s17, %s1014_s10  ;;  %s1019_s13 = sshll.u32 %s1113_s12, 4  ;;  %s1020_s13 = int_to_ptr.vmem [resolvable:$false] %s1019_s13 }
  0x26   : > { %s1021_s14 = scalar_lea.vmem %s1020_s13, 256  ;;  %p1022_p9 = scmp.lt.s32.totalorder %s1221_s17, %s1020_s13 }
  0x27   : > { %p1017_p6 = pnand %p1015_p3, %p1001_p5  ;;  %p1023_p4 = scmp.lt.s32.totalorder %s1021_s14, %s1014_s10 }
  0x29   : > { %p1018_p11 = pneg %p1017_p6  ;;  %p1024_p10 = por %p1023_p4, %p1022_p9 }
  0x2b   : > { %p1025_p12 = pnand %p1024_p10, %p1018_p11 }
  0x2d   : > { %1028 = shalt.err (!%p1025_p12)
}
  0x2e   : > { %932 = dma.hbm_to_vmem [thread:$0]  (!%p1225_p0), %s1219_s15, 128, %s1221_s17, %s205_s19  }
  0x2f   : > { %p1353_p1 = scmp.lt.s32.totalorder %s1111_s25, 3  ;;  %p1354_p2 = scmp.ge.s32.totalorder %s1111_s25, 1 }
  0x31   : > { %p224_p5 = pnand %p1354_p2, %p1353_p1 }
  0x32   : > { %s1261_s16 = sand.u32 (!%p224_p5), 1, %s1095_s21  }
  0x33   : > { %227 = sbr.rel (%p224_p5) target bundleno = 368 (0x170), region = 40  ;;  %s902_s4 = sshll.u32 (!%p224_p5), %s1261_s16, 3 }
  0x34   : > { %s230_s26 = scalar_lea.sflag (!%p224_p5), [#allocation4], %s1261_s16  ;;  %s233_s18 = scalar_lea.vmem (!%p224_p5), [#allocation3], %s902_s4 }
  0x3a   : > { %1082 = dma.done.wait (%p1197_p8), %s230_s26, 128  }
  0x3b   : > { %1084 = vsyncadd (%p1197_p8), %s230_s26, 4294967168  ;;  %v1114_v0 = vmov 0.0   ;;  %v1115_v1 = vmov 0   ;;  %vm276_vm0 = vcmask 1043456   ;;  %vm272_vm1 = vcmask 31744   ;;  %v1271_v2 = vld [vmem:[%s233_s18] sm:$0xff] }
  0x3c   : > { %584 = vmatprep.mubr.f32.mxu0 %v1114_v0  ;;  %347 = vmatprep.mubr.f32.mxu1 %v1114_v0  ;;  %v263_v3 = vld [vmem:[%s1342_s1] sm:$0x3]  ;;  %v271_v5 = vcombine.high %v1271_v2, %v1271_v2  ;;  %v277_v6 = vsel %vm276_vm0, %v1271_v2, 0  ;;  %vm756_vm2 = vcmask 1041408   ;;  %s771_s30 = sld [smem:[#allocation2]]  ;;  %s912_s11 = sshll.u32 %s1103_s23, 7 }
  0x3d   : > { %989 = vset.pattern.permute.xlu0 %v1115_v1  ;;  %v264_v4 = vld [vmem:[%s1343_s2] sm:$0x3]  ;;  %v274_v7 = vsel %vm272_vm1, %v263_v3, 0  ;;  %v283_v8 = vand.u32 4294901760, %v277_v6  ;;  %s259_s10 = scalar_lea.vmem [#allocation6], %s902_s4  ;;  %s1292_s26 = scalar_lea.hbm %s1346_s5, %s912_s11 }
  0x3e   : > { %267 = vperm.xlu0 %989, %v264_v4   ;;  %v348_v9 = vand.u32 4294901760, %v274_v7  ;;  %v748_v10 = vld [vmem:[%s1344_s3] sm:$0x3]  ;;  %v279_v11 = vsel %vm276_vm0, %v271_v5, 0  ;;  %s810_s12 = sshll.u32 %s259_s10, 4  ;;  %s794_s18 = scalar_lea.sflag [#allocation5], %s1261_s16  ;;  %s1294_s12 = int_to_ptr.vmem [resolvable:$true] %s810_s12 }
  0x3f   : > { %v281_v12 = vand.u32 4294901760, %v279_v11  ;;  %v366_v13 = vsub.f32 %v277_v6, %v283_v8  ;;  %s1029_s15 = scalar_lea.vmem %s1294_s12, 128  ;;  %p1355_p9 = scmp.ne.s32.totalorder %s1350_s7, 0 }
  0x40   : > { %v349_v14 = vsub.f32 %v274_v7, %v348_v9  ;;  %p1030_p8 = scmp.ne.s32.totalorder %s1294_s12, %s1029_s15  ;;  %s1116_s23 = smov [#allocation6]  }
  0x41   : > { %519 = vmatprep.subr.mxu0 %v281_v12  ;;  %282 = vmatprep.subr.mxu1 %v281_v12  ;;  %v360_v16 = vsub.f32 %v279_v11, %v281_v12  ;;  %v367_v17 = vand.u32 4294901760, %v366_v13  ;;  %s1033_s4 = sshll.u32 %s1116_s23, 4  ;;  %s1034_s4 = int_to_ptr.vmem [resolvable:$false] %s1033_s4 }
  0x42   : > { %751 = vperm.xlu0 %989, %v748_v10   ;;  %v350_v15 = vand.u32 4294901760, %v349_v14  ;;  %521 = vmatpush1.msra.mxu0 %v283_v8  ;;  %v772_v50 = vstv %s771_s30  ;;  %p1031_p11 = pnand %p1030_p8, %p1355_p9  ;;  %s1035_s17 = scalar_lea.vmem %s1034_s4, 256 }
  0x43   : > { %284 = vmatpush1.msra.mxu1 %v283_v8  ;;  %v361_v19 = vand.u32 4294901760, %v360_v16  ;;  %v368_v20 = vsub.f32 %v366_v13, %v367_v17  ;;  %p1036_p7 = scmp.lt.s32.totalorder %s1294_s12, %s1034_s4  ;;  %p1037_p13 = scmp.lt.s32.totalorder %s1035_s17, %s1029_s15 }
  0x44   : > { %588 = vmatmul.mubr.f32.vlgmr.msra.gmra.mrb[0].mxu0 %v350_v15  ;;  %v351_v18 = vsub.f32 %v349_v14, %v350_v15  ;;  %p1032_p0 = pneg %p1031_p11 }
  0x45   : > { %664 = vmatprep.mubr.f32.mxu0 %v1114_v0  ;;  %v362_v22 = vsub.f32 %v360_v16, %v361_v19  ;;  %597 = vmatprep.subr.mxu0 %v361_v19  ;;  %v369_v23 = vand.u32 4294901760, %v368_v20  ;;  %p1038_p3 = por %p1037_p13, %p1036_p7 }
  0x46   : > { %v352_v21 = vand.u32 4294901760, %v351_v18  ;;  %601 = vmatpush1.msra.mxu0 %v367_v17 }
  0x47   : > { %v363_v24 = vand.u32 4294901760, %v362_v22  ;;  %673 = vmatprep.subr.mxu0 %v281_v12  ;;  %p1039_p6 = pnand %p1038_p3, %p1032_p0 }
  0x48   : > { %353 = vmatmul.mubr.f32.vlgmr.msra.gmra.mrb[0].mxu1 %v352_v21 }
  0x49   : > { %433 = vmatprep.mubr.f32.mxu1 %v1114_v0  ;;  %364 = vmatprep.subr.mxu1 %v363_v24 }
  0x4a   : > { %370 = vmatpush1.msra.mxu1 %v369_v23 }
  0x4b   : > { %443 = vmatprep.subr.mxu1 %v360_v16 }
  0x4c   : > { %666 = vmatmul.mubr.f32.vlgmr.msra.gmra.mrb[0].mxu0 %v348_v9 }
  0x4d   : > { %675 = vmatpush1.msra.mxu0 %v283_v8  ;;  %738 = vmatprep.mubr.f32.mxu0 %v1114_v0 }
  0x50   : > { %435 = vmatmul.mubr.f32.vlgmr.msra.gmra.mrb[0].mxu1 %v348_v9 }
  0x51   : > { %446 = vmatpush1.msra.mxu1 %v366_v13  ;;  %509 = vmatprep.mubr.f32.mxu1 %v1114_v0 }
  0x54   : > { %740 = vmatmul.mubr.f32.vlgmr.msra.gmra.mrb[0].mxu0 %v348_v9 }
  0x58   : > { %512 = vmatmul.mubr.f32.vlgmr.msra.gmra.mrb[0].mxu1 %v349_v14 }
  0xbd   : > { %v268_v27 = vpop.permute.xlu0 %267 }
  0xc1   : > { %v752_v35 = vpop.permute.xlu0 %751 }
 0x127   : > { %v741_v25 = vpop.f32.mrb[0].mxu0 }
 0x128   : > { %v743_v26 = vpop.f32.mrb[1].mxu0 }
 0x12b   : > { %v513_v28 = vpop.f32.mrb[0].mxu1 }
 0x12c   : > { %v913_v29 = vadd.f32 %v513_v28, %v268_v27  ;;  %v515_v30 = vpop.f32.mrb[1].mxu1 }
 0x12d   : > { %v915_v31 = vadd.f32 %v515_v30, %v268_v27 }
 0x12e   : > { %v914_v32 = vadd.f32 %v913_v29, %v741_v25 }
 0x12f   : > { %v916_v33 = vadd.f32 %v915_v31, %v743_v26 }
 0x130   : > { %v746_v34 = vmax.f32 %v914_v32, 0.0 }
 0x131   : > { %v747_v36 = vmax.f32 %v916_v33, 0.0 }
 0x132   : > { %v754_v37 = vmul.f32 %v752_v35, %v746_v34 }
 0x133   : > { %v755_v38 = vmul.f32 %v752_v35, %v747_v36 }
 0x134   : > { %v757_v39 = vsel %vm756_vm2, %v754_v37, 0.0 }
 0x135   : > { %v758_v40 = vrot.slane %v757_v39, 4  ;;  %v764_v41 = vsel %vm756_vm2, %v755_v38, 0.0 }
 0x136   : > { %v765_v42 = vrot.slane %v764_v41, 4 }
 0x137   : > { %v759_v43 = vadd.f32 %v758_v40, %v757_v39 }
 0x138   : > { %v766_v44 = vadd.f32 %v765_v42, %v764_v41 }
 0x139   : > { %v760_v45 = vrot.slane %v759_v43, 2 }
 0x13a   : > { %v767_v46 = vrot.slane %v766_v44, 2 }
 0x13b   : > { %v761_v47 = vadd.f32 %v760_v45, %v759_v43 }
 0x13c   : > { %v768_v48 = vadd.f32 %v767_v46, %v766_v44 }
 0x13d   : > { %v762_v49 = vrot.slane %v761_v47, 1 }
 0x13e   : > { %v769_v51 = vrot.slane %v768_v48, 1 }
 0x13f   : > { %v763_v52 = vadd.f32 %v762_v49, %v761_v47 }
 0x140   : > { %v770_v53 = vadd.f32 %v769_v51, %v768_v48 }
 0x141   : > { %v773_v54 = vadd.f32 %v772_v50, %v763_v52 }
 0x142   : > { %v774_v55 = vadd.f32 %v772_v50, %v770_v53 }
 0x143   : > { %v904_v56 = vmul.f32 -1.442695, %v773_v54 }
 0x144   : > { %v905_v57 = vmul.f32 -1.442695, %v774_v55 }
 0x145   : > { %991 = vpow2.f32 %v904_v56 }
 0x146   : > { %993 = vpow2.f32 %v905_v57 }
 0x14f   : > { %v992_v58 = vpop.eup %991 }
 0x150   : > { %v994_v59 = vpop.eup %993  ;;  %v781_v60 = vadd.f32 1.0, %v992_v58 }
 0x151   : > { %v782_v61 = vadd.f32 1.0, %v994_v59 }
 0x152   : > { %995 = vrcp.f32 %v781_v60 }
 0x153   : > { %997 = vrcp.f32 %v782_v61 }
 0x15c   : > { %v996_v62 = vpop.eup %995 }
 0x15d   : > { %v998_v63 = vpop.eup %997 }
 0x15e   : > { %v789_v0 = vcombine.low %v996_v62, %v998_v63 }
 0x160   : > { %v791_v1 = vmul.f32 %v789_v0, %v1271_v2 }
 0x162   : > { %792 = vst [vmem:[%s259_s10] sm:$0xff] %v791_v1 }
 0x163   : > { %1042 = shalt.err (!%p1039_p6)
}
 0x164   : > { %s1043_s16 = scalar_lea.hbm %s1292_s26, 128  ;;  %s1047_s6 = scalar_lea.hbm %s1346_s5, 256 }
 0x165   : > { %p1044_p4 = scmp.ne.s32.totalorder %s1292_s26, %s1043_s16  ;;  %p1048_p1 = scmp.lt.u32.totalorder %s1292_s26, %s1346_s5 }
 0x166   : > { %p1049_p2 = scmp.lt.u32.totalorder %s1047_s6, %s1043_s16  ;;  %p1051_p8 = scmp.lt.u32.totalorder %s1043_s16, %s1292_s26 }
 0x167   : > { %p1045_p10 = pnand %p1044_p4, %p1355_p9 }
 0x168   : > { %p1050_p5 = por %p1049_p2, %p1048_p1 }
 0x169   : > { %p1046_p12 = pneg %p1045_p10 }
 0x16a   : > { %p1052_p11 = por %p1051_p8, %p1050_p5 }
 0x16c   : > { %p1053_p0 = pnand %p1052_p11, %p1046_p12 }
 0x16e   : > { %1056 = shalt.err (!%p1053_p0)
}
 0x16f   : > { %927 = dma.vmem_to_hbm [thread:$0]  (%p1355_p9), %s1294_s12, 128, %s1292_s26, %s794_s18  }
 0x170 PF: > { %s822_s11 = sand.u32 1, %s1091_s20   ;;  %p1356_p7 = scmp.ne.s32.totalorder %s1351_s9, 0 }
 0x171   : > { %p1357_p13 = scmp.ge.s32.totalorder %s1111_s25, 2  ;;  %s823_s10 = scalar_lea.sflag [#allocation5], %s822_s11 }
 0x173   : > { %p934_p3 = pnand %p1357_p13, %p1356_p7 }
 0x175   : > { %1086 = dma.done.wait (!%p934_p3), %s823_s10, 128  }
 0x176   : > { %1088 = vsyncadd (!%p934_p3), %s823_s10, 4294967168  ;;  %s22_s25 = sadd.s32 1, %s1111_s25   ;;  %s1358_s20 = smov %s1095_s21 }
 0x177   : > { %p19_p6 = scmp.ge.s32.totalorder %s22_s25, 4   ;;  %s1359_s21 = smov %s1099_s22 }
 0x178   : > { %s1360_s22 = smov %s1206_s8  ;;  %s1361_s23 = smov %s1107_s24 }
 0x179   : > { %s1362_s24 = smov %s1364_s27  ;;  %21 = sbr.rel (!%p19_p6) target bundleno = 8 (0x8), region = 85 }
 0x180   :  { %828 = vsyncpa [#allocation4], 1 }
 0x181   :  { %830 = vsyncpa [#allocation4 + $0x1], 1 }
 0x182   :  { %831 = vsyncpa [#allocation5], 1 }
 0x183   :  { %833 = vsyncpa [#allocation5 + $0x1], 1 }

</bundles_post_ra>
